<compile_context>
chip_gen: v7x
topology: tpu7x:2x2x1
jax: 0.10.0
libtpu: 0.0.40
codegen_flags: <defaults>
</compile_context>

<pallas_src>
import math

import jax
import jax.numpy as jnp
from jax.experimental import pallas as pl
from jax.experimental.pallas import tpu as pltpu

# ----------------------------- config (small, matches module structure) -----
B = 2        # batch
S = 8        # sequence length
D = 32       # d_model
H = 4        # num heads
DK = 8       # d_k per head
DV = 8       # d_v per head
DFF = 64     # feed-forward hidden dim
BS = B * S   # batch folded into rows
LN_EPS = 1e-5
NEG_INF = -1e9


def _layernorm(x, gamma, beta):
    # x: [BS, D], gamma/beta: [1, D]
    mu = jnp.mean(x, axis=-1, keepdims=True)
    xc = x - mu
    var = jnp.mean(xc * xc, axis=-1, keepdims=True)
    return xc * jax.lax.rsqrt(var + LN_EPS) * gamma + beta


def encoder_layer_kernel(
    q_ref, k_ref, v_ref, add_mask_ref,
    w_qkv_ref, b_qkv_ref, wo_ref, bo_ref, ln1_g_ref, ln1_b_ref,
    w1_ref, b1_ref, w2_ref, b2_ref, ln2_g_ref, ln2_b_ref,
    out_ref,
):
    q_in = q_ref[...]             # [BS, D] f32
    k_in = k_ref[...]             # [BS, D]
    v_in = v_ref[...]             # [BS, D]
    add_mask = add_mask_ref[...]  # [BS, BS] additive mask (0 or NEG_INF), hoisted

    # ---- fused QKV projection: one MXU dot + one bias add instead of three ----
    # Rows stacked [q; k; v] (cheap sublane concat); weights lane-concatenated
    # [Wq*scale | Wk | Wv]. Only the three diagonal blocks of the
    # [3*BS, 3*H*DK] result are read; the off-diagonal junk adds no extra
    # vmatmul pushes at this size.
    x3 = jnp.concatenate([q_in, k_in, v_in], axis=0)                       # [3*BS, D]
    qkv = (jnp.dot(x3, w_qkv_ref[...], preferred_element_type=jnp.float32)
           + b_qkv_ref[...])                                               # [3*BS, 3*H*DK]

    # ---- multi-head attention; heads accumulated straight into the output
    # projection via per-head sublane slices of Wo (no lane concatenate) ----
    wo = wo_ref[...]                                                       # [H*DV, D]
    att_out = jnp.zeros((BS, D), jnp.float32)
    for h in range(H):  # static unroll, H = 4
        qh = qkv[0 * BS:1 * BS, h * DK:(h + 1) * DK]                            # [BS, DK] (1/sqrt(dk) pre-folded)
        kh = qkv[1 * BS:2 * BS, H * DK + h * DK:H * DK + (h + 1) * DK]          # [BS, DK]
        vh = qkv[2 * BS:3 * BS, 2 * H * DK + h * DV:2 * H * DK + (h + 1) * DV]  # [BS, DV]

        # q @ k^T via dot_general (contract last dims) -> no explicit transpose.
        scores = jax.lax.dot_general(
            qh, kh, (((1,), (1,)), ((), ())),
            preferred_element_type=jnp.float32) + add_mask                 # [BS, BS]

        m = jnp.max(scores, axis=-1, keepdims=True)
        p = jnp.exp(scores - m)
        # pl.reciprocal keeps the divide off the VALU critical path;
        # approx=False preserves 1e-4 parity with the reference.
        inv = pl.reciprocal(jnp.sum(p, axis=-1, keepdims=True), approx=False)
        att = p * inv                                                      # [BS, BS]

        head = jnp.dot(att, vh, preferred_element_type=jnp.float32)        # [BS, DV]
        att_out = att_out + jnp.dot(head, wo[h * DV:(h + 1) * DV, :],
                                    preferred_element_type=jnp.float32)    # [BS, D]

    # ---- output bias + residual + LayerNorm (dropout = identity in eval) ----
    x = _layernorm(q_in + att_out + bo_ref[...], ln1_g_ref[...], ln1_b_ref[...])

    # ---- position-wise feed-forward + residual + LayerNorm ----
    h1 = jnp.maximum(
        jnp.dot(x, w1_ref[...], preferred_element_type=jnp.float32) + b1_ref[...], 0.0)  # [BS, DFF]
    h2 = jnp.dot(h1, w2_ref[...], preferred_element_type=jnp.float32) + b2_ref[...]      # [BS, D]
    y = _layernorm(x + h2, ln2_g_ref[...], ln2_b_ref[...])

    out_ref[...] = y.astype(out_ref.dtype)


_FUSED_ORDER = ("w_qkv", "b_qkv", "wo", "bo", "ln1_g", "ln1_b",
                "w1", "b1", "w2", "b2", "ln2_g", "ln2_b")


def fuse_params(p):
    """One-time parameter prep: fold 1/sqrt(d_k) into Wq/bq and lane-concat the
    Q/K/V projection weights so the kernel runs a single fused QKV matmul."""
    scale = 1.0 / math.sqrt(DK)
    return {
        "w_qkv": jnp.concatenate([p["wq"] * scale, p["wk"], p["wv"]], axis=1),  # [D, 3*H*DK]
        "b_qkv": jnp.concatenate([p["bq"] * scale, p["bk"], p["bv"]], axis=1),  # [1, 3*H*DK]
        "wo": p["wo"], "bo": p["bo"],
        "ln1_g": p["ln1_g"], "ln1_b": p["ln1_b"],
        "w1": p["w1"], "b1": p["b1"], "w2": p["w2"], "b2": p["b2"],
        "ln2_g": p["ln2_g"], "ln2_b": p["ln2_b"],
    }


@jax.jit
def encoder_layer(queries, keys, values, attention_mask, fused_params):
    """queries/keys/values: [B, S, D] f32; attention_mask: [B, 1, 1, S] bool (True = masked key)."""
    b, s, d = queries.shape
    bs = b * s

    # Batch folded into rows (pure reshape, no copy). Whole layer = ONE kernel
    # invocation, everything resident in VMEM, no pipeline bookkeeping.
    q2 = queries.reshape(bs, d)
    k2 = keys.reshape(bs, d)
    v2 = values.reshape(bs, d)

    # Hoisted additive mask: block-diagonal over batches (rows of different
    # batches must not attend to each other) + key-padding mask.
    batch_ids = jnp.arange(bs, dtype=jnp.int32) // s
    block = jnp.where(batch_ids[:, None] == batch_ids[None, :],
                      jnp.float32(0.0), jnp.float32(NEG_INF))             # [BS, BS]
    pad = attention_mask.reshape(1, bs).astype(jnp.float32) * NEG_INF     # [1, BS]
    add_mask = block + pad                                                # [BS, BS]

    vmem = pl.BlockSpec(memory_space=pltpu.MemorySpace.VMEM)
    args = [q2, k2, v2, add_mask] + [fused_params[name] for name in _FUSED_ORDER]

    out = pl.pallas_call(
        encoder_layer_kernel,
        out_shape=jax.ShapeDtypeStruct((bs, d), queries.dtype),
        in_specs=[vmem] * len(args),
        out_specs=vmem,
    )(*args)
    return out.reshape(b, s, d)


def init_params(key):
    """Deterministic synthetic parameters (shapes implied by the module's __init__)."""
    ks = jax.random.split(key, 8)

    def lin(k, fan_in, fan_out):
        w = jax.random.normal(k, (fan_in, fan_out), jnp.float32) * (1.0 / math.sqrt(fan_in))
        b = jnp.zeros((1, fan_out), jnp.float32)
        return w, b

    wq, bq = lin(ks[0], D, H * DK)
    wk, bk = lin(ks[1], D, H * DK)
    wv, bv = lin(ks[2], D, H * DV)
    wo, bo = lin(ks[3], H * DV, D)
    w1, b1 = lin(ks[4], D, DFF)
    w2, b2 = lin(ks[5], DFF, D)
    # give biases non-trivial deterministic values
    bq = 0.01 * jax.random.normal(ks[6], (1, H * DK), jnp.float32)
    b1 = 0.01 * jax.random.normal(ks[7], (1, DFF), jnp.float32)
    return {
        "wq": wq, "bq": bq, "wk": wk, "bk": bk, "wv": wv, "bv": bv,
        "wo": wo, "bo": bo,
        "ln1_g": jnp.ones((1, D), jnp.float32), "ln1_b": jnp.zeros((1, D), jnp.float32),
        "w1": w1, "b1": b1, "w2": w2, "b2": b2,
        "ln2_g": jnp.ones((1, D), jnp.float32), "ln2_b": jnp.zeros((1, D), jnp.float32),
    }


def reference_encoder_layer(q, k, v, mask, p):
    """Pure-JAX reference matching the PyTorch forward (eval mode), uses raw params."""
    b, s, d = q.shape
    add_mask = mask.reshape(b, 1, 1, s).astype(jnp.float32) * NEG_INF

    def proj(x, w, bvec, dh):
        y = jnp.einsum("bsd,dn->bsn", x, w) + bvec                    # [B,S,H*dh]
        return y.reshape(b, s, H, dh).transpose(0, 2, 1, 3)           # [B,H,S,dh]

    qp = proj(q, p["wq"], p["bq"], DK)
    kp = proj(k, p["wk"], p["bk"], DK)
    vp = proj(v, p["wv"], p["bv"], DV)
    scores = jnp.einsum("bhqd,bhkd->bhqk", qp, kp) / math.sqrt(DK) + add_mask
    att = jax.nn.softmax(scores, axis=-1)
    o = jnp.einsum("bhqk,bhkd->bhqd", att, vp).transpose(0, 2, 1, 3).reshape(b, s, H * DV)
    o = jnp.einsum("bsn,nd->bsd", o, p["wo"]) + p["bo"]

    def ln(x, g, be):
        mu = jnp.mean(x, -1, keepdims=True)
        var = jnp.mean((x - mu) ** 2, -1, keepdims=True)
        return (x - mu) * jax.lax.rsqrt(var + LN_EPS) * g + be

    x = ln(q + o, p["ln1_g"], p["ln1_b"])
    h1 = jax.nn.relu(jnp.einsum("bsd,df->bsf", x, p["w1"]) + p["b1"])
    h2 = jnp.einsum("bsf,fd->bsd", h1, p["w2"]) + p["b2"]
    return ln(x + h2, p["ln2_g"], p["ln2_b"])


if __name__ == "__main__":
    key = jax.random.PRNGKey(0)
    kq, kk, kv, kp = jax.random.split(key, 4)

    queries = jax.random.normal(kq, (B, S, D), jnp.float32)
    keys = jax.random.normal(kk, (B, S, D), jnp.float32)
    values = jax.random.normal(kv, (B, S, D), jnp.float32)
    # mask the last two positions of every sequence (True = padding / masked key)
    attention_mask = jnp.zeros((B, 1, 1, S), jnp.bool_).at[:, :, :, -2:].set(True)

    params = init_params(kp)
    fused = fuse_params(params)   # one-time parameter prep (QKV fusion + scale fold)

    out = encoder_layer(queries, keys, values, attention_mask, fused)
    out = jax.block_until_ready(out)

    ref = reference_encoder_layer(queries, keys, values, attention_mask, params)
    assert out.shape == (B, S, D)
    assert jnp.allclose(out, ref, atol=1e-4, rtol=1e-4), "mismatch vs pure-JAX reference"

    print("KERNEL_OK")
</pallas_src>

<mosaic_0001>
module attributes {stable_mosaic.version = 11 : i64} {
  func.func @encoder_layer_kernel(%arg0: memref<16x32xf32, #tpu.memory_space<vmem>>, %arg1: memref<16x32xf32, #tpu.memory_space<vmem>>, %arg2: memref<16x32xf32, #tpu.memory_space<vmem>>, %arg3: memref<16x16xf32, #tpu.memory_space<vmem>>, %arg4: memref<32x96xf32, #tpu.memory_space<vmem>>, %arg5: memref<1x96xf32, #tpu.memory_space<vmem>>, %arg6: memref<32x32xf32, #tpu.memory_space<vmem>>, %arg7: memref<1x32xf32, #tpu.memory_space<vmem>>, %arg8: memref<1x32xf32, #tpu.memory_space<vmem>>, %arg9: memref<1x32xf32, #tpu.memory_space<vmem>>, %arg10: memref<32x64xf32, #tpu.memory_space<vmem>>, %arg11: memref<1x64xf32, #tpu.memory_space<vmem>>, %arg12: memref<64x32xf32, #tpu.memory_space<vmem>>, %arg13: memref<1x32xf32, #tpu.memory_space<vmem>>, %arg14: memref<1x32xf32, #tpu.memory_space<vmem>>, %arg15: memref<1x32xf32, #tpu.memory_space<vmem>>, %arg16: memref<16x32xf32, #tpu.memory_space<vmem>>) attributes {dimension_semantics = [], scalar_prefetch = 0 : i64, scratch_operands = 0 : i64, tpu.core_type = #tpu.core_type<tc>} {
    %c0 = arith.constant 0 : index
    %c0_0 = arith.constant 0 : index
    %0 = vector.load %arg0[%c0, %c0_0] : memref<16x32xf32, #tpu.memory_space<vmem>>, vector<16x32xf32>
    %c0_1 = arith.constant 0 : index
    %c0_2 = arith.constant 0 : index
    %1 = vector.load %arg1[%c0_1, %c0_2] : memref<16x32xf32, #tpu.memory_space<vmem>>, vector<16x32xf32>
    %c0_3 = arith.constant 0 : index
    %c0_4 = arith.constant 0 : index
    %2 = vector.load %arg2[%c0_3, %c0_4] : memref<16x32xf32, #tpu.memory_space<vmem>>, vector<16x32xf32>
    %c0_5 = arith.constant 0 : index
    %c0_6 = arith.constant 0 : index
    %3 = vector.load %arg3[%c0_5, %c0_6] : memref<16x16xf32, #tpu.memory_space<vmem>>, vector<16x16xf32>
    %4 = tpu.concatenate %0, %1, %2 in 0 : vector<16x32xf32>, vector<16x32xf32>, vector<16x32xf32> -> vector<48x32xf32>
    %c0_7 = arith.constant 0 : index
    %c0_8 = arith.constant 0 : index
    %5 = vector.load %arg4[%c0_7, %c0_8] : memref<32x96xf32, #tpu.memory_space<vmem>>, vector<32x96xf32>
    %cst = arith.constant dense<0.000000e+00> : vector<48x96xf32>
    %6 = tpu.matmul %4, %5, %cst {dimension_numbers = #tpu.dot_dimension_numbers<[1], [0], [0], [1], [0, 0, 1, 1], [], []>} : vector<48x32xf32>, vector<32x96xf32>, vector<48x96xf32> -> vector<48x96xf32>
    %c0_9 = arith.constant 0 : index
    %c0_10 = arith.constant 0 : index
    %7 = vector.load %arg5[%c0_9, %c0_10] : memref<1x96xf32, #tpu.memory_space<vmem>>, vector<1x96xf32>
    %8 = vector.broadcast %7 : vector<1x96xf32> to vector<48x96xf32>
    %9 = arith.addf %6, %8 : vector<48x96xf32>
    %c0_11 = arith.constant 0 : index
    %c0_12 = arith.constant 0 : index
    %10 = vector.load %arg6[%c0_11, %c0_12] : memref<32x32xf32, #tpu.memory_space<vmem>>, vector<32x32xf32>
    %cst_13 = arith.constant 0.000000e+00 : f32
    %11 = vector.broadcast %cst_13 : f32 to vector<16x32xf32>
    %12 = vector.extract_strided_slice %9 {offsets = [0, 0], sizes = [16, 8], strides = [1, 1]} : vector<48x96xf32> to vector<16x8xf32>
    %13 = vector.extract_strided_slice %9 {offsets = [16, 32], sizes = [16, 8], strides = [1, 1]} : vector<48x96xf32> to vector<16x8xf32>
    %14 = vector.extract_strided_slice %9 {offsets = [32, 64], sizes = [16, 8], strides = [1, 1]} : vector<48x96xf32> to vector<16x8xf32>
    %cst_14 = arith.constant dense<0.000000e+00> : vector<16x16xf32>
    %15 = tpu.matmul %12, %13, %cst_14 {dimension_numbers = #tpu.dot_dimension_numbers<[1], [1], [0], [0], [0, 0, 1, 0], [], []>} : vector<16x8xf32>, vector<16x8xf32>, vector<16x16xf32> -> vector<16x16xf32>
    %16 = arith.addf %15, %3 : vector<16x16xf32>
    %cst_15 = arith.constant dense<0xFF800000> : vector<16xf32>
    %17 = vector.multi_reduction <maximumf>, %16, %cst_15 [1] : vector<16x16xf32> to vector<16xf32>
    %18 = vector.shape_cast %17 : vector<16xf32> to vector<16x1xf32>
    %19 = vector.broadcast %18 : vector<16x1xf32> to vector<16x16xf32>
    %20 = arith.subf %16, %19 : vector<16x16xf32>
    %21 = math.exp %20 : vector<16x16xf32>
    %cst_16 = arith.constant dense<0.000000e+00> : vector<16xf32>
    %22 = vector.multi_reduction <add>, %21, %cst_16 [1] : vector<16x16xf32> to vector<16xf32>
    %23 = vector.shape_cast %22 : vector<16xf32> to vector<16x1xf32>
    %24 = tpu.reciprocal %23 : vector<16x1xf32> -> vector<16x1xf32>
    %25 = vector.broadcast %24 : vector<16x1xf32> to vector<16x16xf32>
    %26 = arith.mulf %21, %25 : vector<16x16xf32>
    %cst_17 = arith.constant dense<0.000000e+00> : vector<16x8xf32>
    %27 = tpu.matmul %26, %14, %cst_17 {dimension_numbers = #tpu.dot_dimension_numbers<[1], [0], [0], [1], [0, 0, 1, 1], [], []>} : vector<16x16xf32>, vector<16x8xf32>, vector<16x8xf32> -> vector<16x8xf32>
    %28 = vector.extract_strided_slice %10 {offsets = [0, 0], sizes = [8, 32], strides = [1, 1]} : vector<32x32xf32> to vector<8x32xf32>
    %cst_18 = arith.constant dense<0.000000e+00> : vector<16x32xf32>
    %29 = tpu.matmul %27, %28, %cst_18 {dimension_numbers = #tpu.dot_dimension_numbers<[1], [0], [0], [1], [0, 0, 1, 1], [], []>} : vector<16x8xf32>, vector<8x32xf32>, vector<16x32xf32> -> vector<16x32xf32>
    %30 = arith.addf %11, %29 : vector<16x32xf32>
    %31 = vector.extract_strided_slice %9 {offsets = [0, 8], sizes = [16, 8], strides = [1, 1]} : vector<48x96xf32> to vector<16x8xf32>
    %32 = vector.extract_strided_slice %9 {offsets = [16, 40], sizes = [16, 8], strides = [1, 1]} : vector<48x96xf32> to vector<16x8xf32>
    %33 = vector.extract_strided_slice %9 {offsets = [32, 72], sizes = [16, 8], strides = [1, 1]} : vector<48x96xf32> to vector<16x8xf32>
    %cst_19 = arith.constant dense<0.000000e+00> : vector<16x16xf32>
    %34 = tpu.matmul %31, %32, %cst_19 {dimension_numbers = #tpu.dot_dimension_numbers<[1], [1], [0], [0], [0, 0, 1, 0], [], []>} : vector<16x8xf32>, vector<16x8xf32>, vector<16x16xf32> -> vector<16x16xf32>
    %35 = arith.addf %34, %3 : vector<16x16xf32>
    %cst_20 = arith.constant dense<0xFF800000> : vector<16xf32>
    %36 = vector.multi_reduction <maximumf>, %35, %cst_20 [1] : vector<16x16xf32> to vector<16xf32>
    %37 = vector.shape_cast %36 : vector<16xf32> to vector<16x1xf32>
    %38 = vector.broadcast %37 : vector<16x1xf32> to vector<16x16xf32>
    %39 = arith.subf %35, %38 : vector<16x16xf32>
    %40 = math.exp %39 : vector<16x16xf32>
    %cst_21 = arith.constant dense<0.000000e+00> : vector<16xf32>
    %41 = vector.multi_reduction <add>, %40, %cst_21 [1] : vector<16x16xf32> to vector<16xf32>
    %42 = vector.shape_cast %41 : vector<16xf32> to vector<16x1xf32>
    %43 = tpu.reciprocal %42 : vector<16x1xf32> -> vector<16x1xf32>
    %44 = vector.broadcast %43 : vector<16x1xf32> to vector<16x16xf32>
    %45 = arith.mulf %40, %44 : vector<16x16xf32>
    %cst_22 = arith.constant dense<0.000000e+00> : vector<16x8xf32>
    %46 = tpu.matmul %45, %33, %cst_22 {dimension_numbers = #tpu.dot_dimension_numbers<[1], [0], [0], [1], [0, 0, 1, 1], [], []>} : vector<16x16xf32>, vector<16x8xf32>, vector<16x8xf32> -> vector<16x8xf32>
    %47 = vector.extract_strided_slice %10 {offsets = [8, 0], sizes = [8, 32], strides = [1, 1]} : vector<32x32xf32> to vector<8x32xf32>
    %cst_23 = arith.constant dense<0.000000e+00> : vector<16x32xf32>
    %48 = tpu.matmul %46, %47, %cst_23 {dimension_numbers = #tpu.dot_dimension_numbers<[1], [0], [0], [1], [0, 0, 1, 1], [], []>} : vector<16x8xf32>, vector<8x32xf32>, vector<16x32xf32> -> vector<16x32xf32>
    %49 = arith.addf %30, %48 : vector<16x32xf32>
    %50 = vector.extract_strided_slice %9 {offsets = [0, 16], sizes = [16, 8], strides = [1, 1]} : vector<48x96xf32> to vector<16x8xf32>
    %51 = vector.extract_strided_slice %9 {offsets = [16, 48], sizes = [16, 8], strides = [1, 1]} : vector<48x96xf32> to vector<16x8xf32>
    %52 = vector.extract_strided_slice %9 {offsets = [32, 80], sizes = [16, 8], strides = [1, 1]} : vector<48x96xf32> to vector<16x8xf32>
    %cst_24 = arith.constant dense<0.000000e+00> : vector<16x16xf32>
    %53 = tpu.matmul %50, %51, %cst_24 {dimension_numbers = #tpu.dot_dimension_numbers<[1], [1], [0], [0], [0, 0, 1, 0], [], []>} : vector<16x8xf32>, vector<16x8xf32>, vector<16x16xf32> -> vector<16x16xf32>
    %54 = arith.addf %53, %3 : vector<16x16xf32>
    %cst_25 = arith.constant dense<0xFF800000> : vector<16xf32>
    %55 = vector.multi_reduction <maximumf>, %54, %cst_25 [1] : vector<16x16xf32> to vector<16xf32>
    %56 = vector.shape_cast %55 : vector<16xf32> to vector<16x1xf32>
    %57 = vector.broadcast %56 : vector<16x1xf32> to vector<16x16xf32>
    %58 = arith.subf %54, %57 : vector<16x16xf32>
    %59 = math.exp %58 : vector<16x16xf32>
    %cst_26 = arith.constant dense<0.000000e+00> : vector<16xf32>
    %60 = vector.multi_reduction <add>, %59, %cst_26 [1] : vector<16x16xf32> to vector<16xf32>
    %61 = vector.shape_cast %60 : vector<16xf32> to vector<16x1xf32>
    %62 = tpu.reciprocal %61 : vector<16x1xf32> -> vector<16x1xf32>
    %63 = vector.broadcast %62 : vector<16x1xf32> to vector<16x16xf32>
    %64 = arith.mulf %59, %63 : vector<16x16xf32>
    %cst_27 = arith.constant dense<0.000000e+00> : vector<16x8xf32>
    %65 = tpu.matmul %64, %52, %cst_27 {dimension_numbers = #tpu.dot_dimension_numbers<[1], [0], [0], [1], [0, 0, 1, 1], [], []>} : vector<16x16xf32>, vector<16x8xf32>, vector<16x8xf32> -> vector<16x8xf32>
    %66 = vector.extract_strided_slice %10 {offsets = [16, 0], sizes = [8, 32], strides = [1, 1]} : vector<32x32xf32> to vector<8x32xf32>
    %cst_28 = arith.constant dense<0.000000e+00> : vector<16x32xf32>
    %67 = tpu.matmul %65, %66, %cst_28 {dimension_numbers = #tpu.dot_dimension_numbers<[1], [0], [0], [1], [0, 0, 1, 1], [], []>} : vector<16x8xf32>, vector<8x32xf32>, vector<16x32xf32> -> vector<16x32xf32>
    %68 = arith.addf %49, %67 : vector<16x32xf32>
    %69 = vector.extract_strided_slice %9 {offsets = [0, 24], sizes = [16, 8], strides = [1, 1]} : vector<48x96xf32> to vector<16x8xf32>
    %70 = vector.extract_strided_slice %9 {offsets = [16, 56], sizes = [16, 8], strides = [1, 1]} : vector<48x96xf32> to vector<16x8xf32>
    %71 = vector.extract_strided_slice %9 {offsets = [32, 88], sizes = [16, 8], strides = [1, 1]} : vector<48x96xf32> to vector<16x8xf32>
    %cst_29 = arith.constant dense<0.000000e+00> : vector<16x16xf32>
    %72 = tpu.matmul %69, %70, %cst_29 {dimension_numbers = #tpu.dot_dimension_numbers<[1], [1], [0], [0], [0, 0, 1, 0], [], []>} : vector<16x8xf32>, vector<16x8xf32>, vector<16x16xf32> -> vector<16x16xf32>
    %73 = arith.addf %72, %3 : vector<16x16xf32>
    %cst_30 = arith.constant dense<0xFF800000> : vector<16xf32>
    %74 = vector.multi_reduction <maximumf>, %73, %cst_30 [1] : vector<16x16xf32> to vector<16xf32>
    %75 = vector.shape_cast %74 : vector<16xf32> to vector<16x1xf32>
    %76 = vector.broadcast %75 : vector<16x1xf32> to vector<16x16xf32>
    %77 = arith.subf %73, %76 : vector<16x16xf32>
    %78 = math.exp %77 : vector<16x16xf32>
    %cst_31 = arith.constant dense<0.000000e+00> : vector<16xf32>
    %79 = vector.multi_reduction <add>, %78, %cst_31 [1] : vector<16x16xf32> to vector<16xf32>
    %80 = vector.shape_cast %79 : vector<16xf32> to vector<16x1xf32>
    %81 = tpu.reciprocal %80 : vector<16x1xf32> -> vector<16x1xf32>
    %82 = vector.broadcast %81 : vector<16x1xf32> to vector<16x16xf32>
    %83 = arith.mulf %78, %82 : vector<16x16xf32>
    %cst_32 = arith.constant dense<0.000000e+00> : vector<16x8xf32>
    %84 = tpu.matmul %83, %71, %cst_32 {dimension_numbers = #tpu.dot_dimension_numbers<[1], [0], [0], [1], [0, 0, 1, 1], [], []>} : vector<16x16xf32>, vector<16x8xf32>, vector<16x8xf32> -> vector<16x8xf32>
    %85 = vector.extract_strided_slice %10 {offsets = [24, 0], sizes = [8, 32], strides = [1, 1]} : vector<32x32xf32> to vector<8x32xf32>
    %cst_33 = arith.constant dense<0.000000e+00> : vector<16x32xf32>
    %86 = tpu.matmul %84, %85, %cst_33 {dimension_numbers = #tpu.dot_dimension_numbers<[1], [0], [0], [1], [0, 0, 1, 1], [], []>} : vector<16x8xf32>, vector<8x32xf32>, vector<16x32xf32> -> vector<16x32xf32>
    %87 = arith.addf %68, %86 : vector<16x32xf32>
    %88 = arith.addf %0, %87 : vector<16x32xf32>
    %c0_34 = arith.constant 0 : index
    %c0_35 = arith.constant 0 : index
    %89 = vector.load %arg7[%c0_34, %c0_35] : memref<1x32xf32, #tpu.memory_space<vmem>>, vector<1x32xf32>
    %90 = vector.broadcast %89 : vector<1x32xf32> to vector<16x32xf32>
    %91 = arith.addf %88, %90 : vector<16x32xf32>
    %c0_36 = arith.constant 0 : index
    %c0_37 = arith.constant 0 : index
    %92 = vector.load %arg8[%c0_36, %c0_37] : memref<1x32xf32, #tpu.memory_space<vmem>>, vector<1x32xf32>
    %c0_38 = arith.constant 0 : index
    %c0_39 = arith.constant 0 : index
    %93 = vector.load %arg9[%c0_38, %c0_39] : memref<1x32xf32, #tpu.memory_space<vmem>>, vector<1x32xf32>
    %cst_40 = arith.constant dense<0.000000e+00> : vector<16xf32>
    %94 = vector.multi_reduction <add>, %91, %cst_40 [1] : vector<16x32xf32> to vector<16xf32>
    %95 = vector.shape_cast %94 : vector<16xf32> to vector<16x1xf32>
    %cst_41 = arith.constant 3.200000e+01 : f32
    %96 = vector.broadcast %cst_41 : f32 to vector<16x1xf32>
    %97 = arith.divf %95, %96 : vector<16x1xf32>
    %98 = vector.broadcast %97 : vector<16x1xf32> to vector<16x32xf32>
    %99 = arith.subf %91, %98 : vector<16x32xf32>
    %100 = arith.mulf %99, %99 : vector<16x32xf32>
    %cst_42 = arith.constant dense<0.000000e+00> : vector<16xf32>
    %101 = vector.multi_reduction <add>, %100, %cst_42 [1] : vector<16x32xf32> to vector<16xf32>
    %102 = vector.shape_cast %101 : vector<16xf32> to vector<16x1xf32>
    %cst_43 = arith.constant 3.200000e+01 : f32
    %103 = vector.broadcast %cst_43 : f32 to vector<16x1xf32>
    %104 = arith.divf %102, %103 : vector<16x1xf32>
    %cst_44 = arith.constant 9.99999974E-6 : f32
    %105 = vector.broadcast %cst_44 : f32 to vector<16x1xf32>
    %106 = arith.addf %104, %105 : vector<16x1xf32>
    %107 = math.rsqrt %106 : vector<16x1xf32>
    %108 = vector.broadcast %107 : vector<16x1xf32> to vector<16x32xf32>
    %109 = arith.mulf %99, %108 : vector<16x32xf32>
    %110 = vector.broadcast %92 : vector<1x32xf32> to vector<16x32xf32>
    %111 = arith.mulf %109, %110 : vector<16x32xf32>
    %112 = vector.broadcast %93 : vector<1x32xf32> to vector<16x32xf32>
    %113 = arith.addf %111, %112 : vector<16x32xf32>
    %c0_45 = arith.constant 0 : index
    %c0_46 = arith.constant 0 : index
    %114 = vector.load %arg10[%c0_45, %c0_46] : memref<32x64xf32, #tpu.memory_space<vmem>>, vector<32x64xf32>
    %cst_47 = arith.constant dense<0.000000e+00> : vector<16x64xf32>
    %115 = tpu.matmul %113, %114, %cst_47 {dimension_numbers = #tpu.dot_dimension_numbers<[1], [0], [0], [1], [0, 0, 1, 1], [], []>} : vector<16x32xf32>, vector<32x64xf32>, vector<16x64xf32> -> vector<16x64xf32>
    %c0_48 = arith.constant 0 : index
    %c0_49 = arith.constant 0 : index
    %116 = vector.load %arg11[%c0_48, %c0_49] : memref<1x64xf32, #tpu.memory_space<vmem>>, vector<1x64xf32>
    %117 = vector.broadcast %116 : vector<1x64xf32> to vector<16x64xf32>
    %118 = arith.addf %115, %117 : vector<16x64xf32>
    %cst_50 = arith.constant 0.000000e+00 : f32
    %119 = vector.broadcast %cst_50 : f32 to vector<16x64xf32>
    %120 = arith.maximumf %118, %119 : vector<16x64xf32>
    %c0_51 = arith.constant 0 : index
    %c0_52 = arith.constant 0 : index
    %121 = vector.load %arg12[%c0_51, %c0_52] : memref<64x32xf32, #tpu.memory_space<vmem>>, vector<64x32xf32>
    %cst_53 = arith.constant dense<0.000000e+00> : vector<16x32xf32>
    %122 = tpu.matmul %120, %121, %cst_53 {dimension_numbers = #tpu.dot_dimension_numbers<[1], [0], [0], [1], [0, 0, 1, 1], [], []>} : vector<16x64xf32>, vector<64x32xf32>, vector<16x32xf32> -> vector<16x32xf32>
    %c0_54 = arith.constant 0 : index
    %c0_55 = arith.constant 0 : index
    %123 = vector.load %arg13[%c0_54, %c0_55] : memref<1x32xf32, #tpu.memory_space<vmem>>, vector<1x32xf32>
    %124 = vector.broadcast %123 : vector<1x32xf32> to vector<16x32xf32>
    %125 = arith.addf %122, %124 : vector<16x32xf32>
    %126 = arith.addf %113, %125 : vector<16x32xf32>
    %c0_56 = arith.constant 0 : index
    %c0_57 = arith.constant 0 : index
    %127 = vector.load %arg14[%c0_56, %c0_57] : memref<1x32xf32, #tpu.memory_space<vmem>>, vector<1x32xf32>
    %c0_58 = arith.constant 0 : index
    %c0_59 = arith.constant 0 : index
    %128 = vector.load %arg15[%c0_58, %c0_59] : memref<1x32xf32, #tpu.memory_space<vmem>>, vector<1x32xf32>
    %cst_60 = arith.constant dense<0.000000e+00> : vector<16xf32>
    %129 = vector.multi_reduction <add>, %126, %cst_60 [1] : vector<16x32xf32> to vector<16xf32>
    %130 = vector.shape_cast %129 : vector<16xf32> to vector<16x1xf32>
    %cst_61 = arith.constant 3.200000e+01 : f32
    %131 = vector.broadcast %cst_61 : f32 to vector<16x1xf32>
    %132 = arith.divf %130, %131 : vector<16x1xf32>
    %133 = vector.broadcast %132 : vector<16x1xf32> to vector<16x32xf32>
    %134 = arith.subf %126, %133 : vector<16x32xf32>
    %135 = arith.mulf %134, %134 : vector<16x32xf32>
    %cst_62 = arith.constant dense<0.000000e+00> : vector<16xf32>
    %136 = vector.multi_reduction <add>, %135, %cst_62 [1] : vector<16x32xf32> to vector<16xf32>
    %137 = vector.shape_cast %136 : vector<16xf32> to vector<16x1xf32>
    %cst_63 = arith.constant 3.200000e+01 : f32
    %138 = vector.broadcast %cst_63 : f32 to vector<16x1xf32>
    %139 = arith.divf %137, %138 : vector<16x1xf32>
    %cst_64 = arith.constant 9.99999974E-6 : f32
    %140 = vector.broadcast %cst_64 : f32 to vector<16x1xf32>
    %141 = arith.addf %139, %140 : vector<16x1xf32>
    %142 = math.rsqrt %141 : vector<16x1xf32>
    %143 = vector.broadcast %142 : vector<16x1xf32> to vector<16x32xf32>
    %144 = arith.mulf %134, %143 : vector<16x32xf32>
    %145 = vector.broadcast %127 : vector<1x32xf32> to vector<16x32xf32>
    %146 = arith.mulf %144, %145 : vector<16x32xf32>
    %147 = vector.broadcast %128 : vector<1x32xf32> to vector<16x32xf32>
    %148 = arith.addf %146, %147 : vector<16x32xf32>
    %c0_65 = arith.constant 0 : index
    %c0_66 = arith.constant 0 : index
    %149 = vector.load %arg16[%c0_65, %c0_66] : memref<16x32xf32, #tpu.memory_space<vmem>>, vector<16x32xf32>
    tpu.vector_store %arg16[%c0_65, %c0_66], %148 {strides = array<i32>} : memref<16x32xf32, #tpu.memory_space<vmem>>, vector<16x32xf32>,
    return
  }
}

</mosaic_0001>

<bundles_post_ra>
// kernel: encoder_layer.1
= control target key start
LH: loop header
LB: loop body
LE: loop exit
PB: predicated region body
PF: predicated region fallthrough
CT: control target
= control target key end

     0   :  { %s2620_s0 = inlined_call_operand.vmem [shape: f32[16,32], index: 0, kind: input, shape index: {}]   ;;  %s2621_s1 = inlined_call_operand.vmem [shape: f32[16,32], index: 1, kind: input, shape index: {}]   ;;  %s2622_s2 = inlined_call_operand.hbm [shape: f32[16,32], index: 2, kind: input, shape index: {}]   ;;  %s2623_s3 = inlined_call_operand.vmem [shape: f32[16,16], index: 3, kind: input, shape index: {}]   ;;  %s2624_s4 = inlined_call_operand.vmem [shape: f32[32,96], index: 4, kind: input, shape index: {}]   ;;  %s2625_s5 = inlined_call_operand.hbm [shape: f32[1,96], index: 5, kind: input, shape index: {}]   ;;  %s2626_s6 = inlined_call_operand.vmem [shape: f32[32,32], index: 6, kind: input, shape index: {}]   ;;  %s2627_s7 = inlined_call_operand.vmem [shape: f32[1,32], index: 7, kind: input, shape index: {}]   ;;  %s2628_s8 = inlined_call_operand.vmem [shape: f32[1,32], index: 8, kind: input, shape index: {}]   ;;  %s2629_s9 = inlined_call_operand.vmem [shape: f32[1,32], index: 9, kind: input, shape index: {}]   ;;  %s2630_s10 = inlined_call_operand.vmem [shape: f32[32,64], index: 10, kind: input, shape index: {}]   ;;  %s2631_s11 = inlined_call_operand.hbm [shape: f32[1,64], index: 11, kind: input, shape index: {}]   ;;  %s2632_s12 = inlined_call_operand.vmem [shape: f32[64,32], index: 12, kind: input, shape index: {}]   ;;  %s2633_s13 = inlined_call_operand.hbm [shape: f32[1,32], index: 13, kind: input, shape index: {}]   ;;  %s2634_s14 = inlined_call_operand.vmem [shape: f32[1,32], index: 14, kind: input, shape index: {}]   ;;  %s2635_s15 = inlined_call_operand.vmem [shape: f32[1,32], index: 15, kind: input, shape index: {}]   ;;  %s2636_s16 = inlined_call_operand.hbm [shape: f32[16,32], index: 16, kind: output, shape index: {}]  }
   0x1   :  { %2638 = sst [smem:[#allocation15_spill]] %s2620_s0 }
   0x2   :  { %21 = vsyncpa [#allocation3], 0 }
   0x3   :  { %22 = vsyncpa [#allocation6], 0 }
   0x4   :  { %23 = vsyncpa [#allocation9], 0 }
   0x5   :  { %24 = vsyncpa [#allocation4], 0  ;;  %s2223_s21 = smov [#allocation5]   ;;  %s2224_s23 = smov [#allocation2]  }
   0x6   :  { %s51_s22 = sshll.u32 %s2223_s21, 4  ;;  %s34_s24 = sshll.u32 %s2224_s23, 4  ;;  %s52_s22 = int_to_ptr.vmem [resolvable:$true] %s51_s22  ;;  %s2326_s24 = int_to_ptr.vmem [resolvable:$true] %s34_s24 }
   0x7   :  { %s2105_s27 = scalar_lea.hbm %s2625_s5, 16 }
   0x8   :  { %p2106_p0 = scmp.ne.s32.totalorder %s2625_s5, %s2105_s27  ;;  %p2109_p1 = scmp.lt.u32.totalorder %s2105_s27, %s2625_s5 }
   0xa   :  { %p2111_p2 = pnand %p2109_p1, %p2106_p0 }
   0xc   :  { %2114 = shalt.err (!%p2111_p2)
}
   0xd   :  { %s2115_s17 = scalar_lea.vmem %s52_s22, 16  ;;  %s2119_s18 = scalar_lea.vmem %s52_s22, 32 }
   0xe   :  { %p2116_p3 = scmp.ne.s32.totalorder %s52_s22, %s2115_s17  ;;  %p2120_p4 = scmp.lt.s32.totalorder %s52_s22, %s52_s22 }
   0xf   :  { %p2121_p5 = scmp.lt.s32.totalorder %s2119_s18, %s2115_s17 }
  0x11   :  { %p2122_p6 = por %p2121_p5, %p2120_p4 }
  0x13   :  { %p2123_p7 = pnand %p2122_p6, %p2116_p3 }
  0x15   :  { %2126 = shalt.err (!%p2123_p7)
}
  0x16   :  { %54 = dma.hbm_to_vmem [thread:$0]  %s2625_s5, 16, %s52_s22, [#allocation6]  }
  0x17   :  { %s2127_s25 = scalar_lea.hbm %s2622_s2, 256 }
  0x18   :  { %p2128_p8 = scmp.ne.s32.totalorder %s2622_s2, %s2127_s25  ;;  %p2131_p9 = scmp.lt.u32.totalorder %s2127_s25, %s2622_s2 }
  0x1a   :  { %p2133_p10 = pnand %p2131_p9, %p2128_p8 }
  0x1c   :  { %2136 = shalt.err (!%p2133_p10)
}
  0x1d   :  { %s2137_s30 = scalar_lea.vmem %s2326_s24, 256  ;;  %p2142_p12 = scmp.lt.s32.totalorder %s2326_s24, %s2326_s24 }
  0x1e   :  { %p2138_p11 = scmp.ne.s32.totalorder %s2326_s24, %s2137_s30  ;;  %p2143_p13 = scmp.lt.s32.totalorder %s2137_s30, %s2137_s30 }
  0x20   :  { %p2144_p0 = por %p2143_p13, %p2142_p12 }
  0x22   :  { %p2145_p1 = pnand %p2144_p0, %p2138_p11 }
  0x24   :  { %2148 = shalt.err (!%p2145_p1)
}
  0x25   :  { %s2225_s5 = smov 128   ;;  %s2226_s22 = smov 8  }
  0x26   :  { %40 = dma.hbm_to_vmem [thread:$0]  %s2622_s2, 256, %s2326_s24, [#allocation3], %s2225_s5, %s2225_s5, %s2226_s22  }
  0x27   :  { %s2227_s18 = smov [#allocation7]   ;;  %s2228_s20 = smov [#allocation8]  }
  0x28   :  { %s71_s19 = sshll.u32 %s2227_s18, 4  ;;  %s83_s21 = sshll.u32 %s2228_s20, 4  ;;  %s72_s19 = int_to_ptr.vmem [resolvable:$true] %s71_s19  ;;  %s84_s21 = int_to_ptr.vmem [resolvable:$true] %s83_s21 }
  0x29   :  { %s2149_s26 = scalar_lea.hbm %s2631_s11, 16 }
  0x2a   :  { %p2150_p2 = scmp.ne.s32.totalorder %s2631_s11, %s2149_s26  ;;  %p2153_p3 = scmp.lt.u32.totalorder %s2149_s26, %s2631_s11 }
  0x2c   :  { %p2155_p4 = pnand %p2153_p3, %p2150_p2 }
  0x2e   :  { %2158 = shalt.err (!%p2155_p4)
}
  0x2f   :  { %s2159_s2 = scalar_lea.vmem %s72_s19, 16  ;;  %s2163_s24 = scalar_lea.vmem %s72_s19, 32 }
  0x30   :  { %p2160_p5 = scmp.ne.s32.totalorder %s72_s19, %s2159_s2  ;;  %p2164_p6 = scmp.lt.s32.totalorder %s72_s19, %s72_s19 }
  0x31   :  { %p2165_p7 = scmp.lt.s32.totalorder %s2163_s24, %s2159_s2 }
  0x33   :  { %p2166_p8 = por %p2165_p7, %p2164_p6 }
  0x35   :  { %p2167_p9 = pnand %p2166_p8, %p2160_p5 }
  0x37   :  { %2170 = shalt.err (!%p2167_p9)
}
  0x38   :  { %74 = dma.hbm_to_vmem [thread:$0]  %s2631_s11, 16, %s72_s19, [#allocation6]  }
  0x39   :  { %s2171_s23 = scalar_lea.hbm %s2633_s13, 16 }
  0x3a   :  { %p2172_p10 = scmp.ne.s32.totalorder %s2633_s13, %s2171_s23  ;;  %p2175_p11 = scmp.lt.u32.totalorder %s2171_s23, %s2633_s13 }
  0x3c   :  { %p2177_p12 = pnand %p2175_p11, %p2172_p10 }
  0x3e   :  { %2180 = shalt.err (!%p2177_p12)
}
  0x3f   :  { %s2181_s29 = scalar_lea.vmem %s84_s21, 16  ;;  %s2185_s30 = scalar_lea.vmem %s84_s21, 32 }
  0x40   :  { %p2182_p13 = scmp.ne.s32.totalorder %s84_s21, %s2181_s29  ;;  %p2186_p0 = scmp.lt.s32.totalorder %s84_s21, %s84_s21 }
  0x41   :  { %p2187_p1 = scmp.lt.s32.totalorder %s2185_s30, %s2181_s29 }
  0x43   :  { %p2188_p2 = por %p2187_p1, %p2186_p0 }
  0x45   :  { %p2189_p3 = pnand %p2188_p2, %p2182_p13 }
  0x47   :  { %2192 = shalt.err (!%p2189_p3)
}
  0x48   :  { %86 = dma.hbm_to_vmem [thread:$0]  %s2633_s13, 16, %s84_s21, [#allocation9]  }
  0x49   :  { %2215 = dma.done.wait [#allocation3], 256  }
  0x4a   :  { %2216 = vsyncadd [#allocation3], 4294967040 }
  0x4b   :  { %2217 = dma.done.wait [#allocation6], 32  }
  0x4c   :  { %2218 = vsyncadd [#allocation6], 4294967264 }
  0x4d   :  { %2219 = dma.done.wait [#allocation9], 16  }
  0x4e   :  { %2220 = vsyncadd [#allocation9], 4294967280  ;;  %vm122_vm0 = vcmask 261120   ;;  %v111_v0 = vld [vmem:[%s2624_s4] sm:$0xff]  ;;  %v112_v1 = vld [vmem:[%s2624_s4 + $0x8] sm:$0xff]  ;;  %s2639_s26 = sld [smem:[#allocation15_spill]] }
  0x4f   :  { %v113_v2 = vld [vmem:[%s2624_s4 + $0x10] sm:$0xff]  ;;  %v1929_v3 = vpack.c.bf16 %v112_v1, %v111_v0  ;;  %v114_v4 = vld [vmem:[%s2624_s4 + $0x18] sm:$0xff]  ;;  %v105_v8 = vld [vmem:[%s2621_s1] sm:$0xff]  ;;  %vm246_vm1 = vcmask 64512   ;;  %s2229_s19 = smov 120   ;;  %s2231_s2 = smov 112  }
  0x50   :  { %v1933_v6 = vpack.c.bf16 %v114_v4, %v113_v2  ;;  %v106_v9 = vld [vmem:[%s2621_s1 + $0x8] sm:$0xff]  ;;  %v107_v10 = vld [vmem:[#allocation2] sm:$0xff]  ;;  %v1686_v12 = vld [vmem:[#allocation5] ss:$0 sm:$0xff]  ;;  %s2230_s1 = smov 96   ;;  %s2232_s24 = smov 88  }
  0x51   :  { %1930 = vmatprep.subr.bf16.mxu0 %v1929_v3  ;;  %v108_v11 = vld [vmem:[#allocation2 + $0x8] sm:$0xff]  ;;  %s2233_s0 = smov 80   ;;  %vm2437_vm2 = vmpackc.low %vm246_vm1, %vm246_vm1  ;;  %v2469_v45 = vld [vmem:[%s2623_s3] sm:$0xff]  ;;  %vm332_vm3 = vcmask 130048   ;;  %s2235_s21 = smov 72   ;;  %vm1537_vm4 = vcmask 523264  }
  0x52   :  { %1932 = vmatpush3.bf16.msra.mxu0 %v1929_v3  ;;  %v2464_v44 = vld [vmem:[%s2623_s3 + $0x8] sm:$0xff]  ;;  %s2234_s3 = smov 56   ;;  %s2236_s23 = smov 64  }
  0x53   :  { %1934 = vmatprep.subr.bf16.mxu0 %v1933_v6  ;;  %s2237_s25 = smov 104   ;;  %s2239_s27 = smov 40  }
  0x54   :  { %v2399_v5 = vld [vmem:[%s2639_s26] sm:$0xff]  ;;  %v2406_v7 = vld [vmem:[%s2639_s26 + $0x8] sm:$0xff]  ;;  %s2238_s26 = smov 48  }
  0x55   :  { %1814 = vmatprep.mubr.msk.f32.mxu0 %vm122_vm0, %v2399_v5 }
  0x56   :  { %1936 = vmatpush3.bf16.msra.mxu0 %v1933_v6 }
  0x59   :  { %1815 = vmatmul.mubr.msk.f32.vlgmr.msra.gmra.mrb[0].mxu0 %vm122_vm0, %v2406_v7 }
  0x5a   :  { %1817 = vmatprep.mubr.msk.f32.mxu0 %vm122_vm0, %v105_v8 }
  0x5d   :  { %1818 = vmatmul.mubr.msk.f32.gmra.mrb[2].mxu0 %vm122_vm0, %v106_v9 }
  0x5e   :  { %1820 = vmatprep.mubr.msk.f32.mxu0 %vm122_vm0, %v107_v10 }
  0x61   :  { %1821 = vmatmul.mubr.msk.f32.gmra.mrb[4].mxu0 %vm122_vm0, %v108_v11 }
 0x12c   :  { %v1816_v13 = vpop.f32.mrb[0].mxu0 }
 0x12d   :  { %v207_v14 = vpop.f32.mrb[1].mxu0  ;;  %v2425_v19 = vadd.f32 %v1816_v13, %v1686_v12 }
 0x12e   :  { %v2420_v15 = vadd.f32 %v1686_v12, %v207_v14 }
 0x130   :  { %v1819_v16 = vpop.f32.mrb[2].mxu0  ;;  %444 = vrot.lane.b32.xlu1 %v2420_v15, %s2229_s19  ;;  %1827 = vmatprep.mubr.msk.f32.mxu0 %vm246_vm1, %v2420_v15 }
 0x131   :  { %v223_v17 = vadd.f32 %v1819_v16, %v1686_v12  ;;  %v217_v18 = vpop.f32.mrb[3].mxu0 }
 0x132   :  { %v218_v20 = vadd.f32 %v1686_v12, %v217_v18 }
 0x134   :  { %446 = vrot.lane.b32.xlu1 %v2425_v19, %s2229_s19  ;;  %v2428_v21 = vpack.i.bf16 %v223_v17, %v218_v20  ;;  %v1822_v22 = vpop.f32.mrb[4].mxu0 }
 0x135   :  { %v227_v23 = vpop.f32.mrb[5].mxu0  ;;  %v233_v41 = vadd.f32 %v1822_v22, %v1686_v12 }
 0x136   :  { %2026 = vrot.lane.b32.xlu0 %v2428_v21, %s2230_s1  ;;  %v228_v42 = vadd.f32 %v1686_v12, %v227_v23 }
 0x138   :  { %806 = vrot.lane.b32.xlu1 %v2420_v15, %s2231_s2  ;;  %v2459_v43 = vpack.i.bf16 %v233_v41, %v228_v42 }
 0x13a   :  { %2031 = vrot.lane.b32.xlu0 %v2428_v21, %s2232_s24 }
 0x13e   :  { %2036 = vrot.lane.b32.xlu0 %v2428_v21, %s2233_s0 }
 0x142   :  { %808 = vrot.lane.b32.xlu0 %v2425_v19, %s2231_s2 }
 0x1a2   :  { %v445_v34 = vpop.permute.xlu1 %444 }
 0x1a6   :  { %v447_v38 = vpop.permute.xlu1 %446 }
 0x1a8   :  { %v2027_v24 = vpop.permute.xlu0 %2026 }
 0x1a9   :  { %v2029_v25 = vunpack.i.h.bf16 %v2027_v24  ;;  %v2028_v26 = vunpack.i.l.bf16 %v2027_v24 }
 0x1aa   :  { %v807_v39 = vpop.permute.xlu1 %806 }
 0x1ab   :  { %v1937_v28 = vpack.c.bf16 %v2029_v25, %v2028_v26 }
 0x1ac   :  { %v2032_v29 = vpop.permute.xlu0 %2031 }
 0x1ad   :  { %v2034_v30 = vunpack.i.h.bf16 %v2032_v29  ;;  %v2033_v31 = vunpack.i.l.bf16 %v2032_v29  ;;  %1939 = vmatprep.subr.msk.bf16.mxu0 %vm2437_vm2, %v1937_v28 }
 0x1ae   :  { %1942 = vmatpush3.bf16.xpose.msk.msra.mxu0 %vm2437_vm2, %v1937_v28 }
 0x1af   :  { %v1947_v32 = vpack.c.bf16 %v2034_v30, %v2033_v31 }
 0x1b0   :  { %v2037_v33 = vpop.permute.xlu0 %2036 }
 0x1b1   :  { %v2039_v35 = vunpack.i.h.bf16 %v2037_v33  ;;  %v2038_v36 = vunpack.i.l.bf16 %v2037_v33  ;;  %1949 = vmatprep.subr.msk.bf16.mxu0 %vm2437_vm2, %v1947_v32 }
 0x1b3   :  { %v1957_v37 = vpack.c.bf16 %v2039_v35, %v2038_v36 }
 0x1b4   :  { %v809_v40 = vpop.permute.xlu0 %808 }
 0x1b5   :  { %1828 = vmatmul.mubr.msk.f32.vlgmr.msra.gmra.mrb[6].mxu0 %vm246_vm1, %v2425_v19 }
 0x1b6   :  { %1952 = vmatpush3.bf16.xpose.msk.msra.mxu0 %vm2437_vm2, %v1947_v32  ;;  %1841 = vmatprep.mubr.msk.f32.mxu0 %vm246_vm1, %v445_v34 }
 0x1b7   :  { %1959 = vmatprep.subr.msk.bf16.mxu0 %vm2437_vm2, %v1957_v37 }
 0x1bd   :  { %1842 = vmatmul.mubr.msk.f32.vlgmr.msra.gmra.mrb[8].mxu0 %vm246_vm1, %v447_v38 }
 0x1be   :  { %1962 = vmatpush3.bf16.xpose.msk.msra.mxu0 %vm2437_vm2, %v1957_v37  ;;  %1865 = vmatprep.mubr.msk.f32.mxu0 %vm246_vm1, %v807_v39 }
 0x1c5   :  { %1866 = vmatmul.mubr.msk.f32.vlgmr.msra.gmra.mrb[10].mxu0 %vm246_vm1, %v809_v40 }
 0x288   :  { %v1829_v46 = vpop.f32.mrb[6].mxu0 }
 0x289   :  { %v329_v47 = vadd.f32 %v1829_v46, %v2464_v44  ;;  %v323_v48 = vpop.f32.mrb[7].mxu0 }
 0x28a   :  { %v324_v49 = vadd.f32 %v323_v48, %v2469_v45 }
 0x28b   :  { %v336_v50 = vsel %vm332_vm3, %v329_v47, -inf }
 0x28c   :  { %337 = vmax.xlane.f32.xlu0 %v336_v50  ;;  %v333_v51 = vsel %vm332_vm3, %v324_v49, -inf }
 0x28d   :  { %334 = vmax.xlane.f32.xlu1 %v333_v51 }
 0x290   :  { %v1843_v52 = vpop.f32.mrb[8].mxu0 }
 0x291   :  { %v532_v53 = vadd.f32 %v1843_v52, %v2464_v44  ;;  %v526_v54 = vpop.f32.mrb[9].mxu0 }
 0x292   :  { %v527_v55 = vadd.f32 %v526_v54, %v2469_v45 }
 0x293   :  { %v538_v56 = vsel %vm332_vm3, %v532_v53, -inf }
 0x294   :  { %539 = vmax.xlane.f32.xlu1 %v538_v56  ;;  %v535_v57 = vsel %vm332_vm3, %v527_v55, -inf }
 0x295   :  { %536 = vmax.xlane.f32.xlu0 %v535_v57 }
 0x298   :  { %v1867_v58 = vpop.f32.mrb[10].mxu0 }
 0x299   :  { %v888_v59 = vpop.f32.mrb[11].mxu0  ;;  %v894_v22 = vadd.f32 %v1867_v58, %v2464_v44 }
 0x29a   :  { %v889_v20 = vadd.f32 %v888_v59, %v2469_v45 }
 0x29b   :  { %v900_v24 = vsel %vm332_vm3, %v894_v22, -inf }
 0x29c   :  { %v897_v23 = vsel %vm332_vm3, %v889_v20, -inf }
 0x319   :  { %v338_v60 = vpop.xlane.xlu0 %337 }
 0x31a   :  { %v340_v61 = vsub.f32 %v329_v47, %v338_v60  ;;  %v335_v62 = vpop.xlane.xlu1 %334  ;;  %v237_v60 = vld [vmem:[%s2626_s6 + $0x8] sm:$0xff] }
 0x31b   :  { %v339_v63 = vsub.f32 %v324_v49, %v335_v62 }
 0x31c   :  { %v343_v0 = vmul.f32 1.442695, %v340_v61  ;;  %v236_v61 = vld [vmem:[%s2626_s6] sm:$0xff] }
 0x31d   :  { %v341_v1 = vmul.f32 1.442695, %v339_v63 }
 0x31e   :  { %2065 = vpow2.f32 %v343_v0 }
 0x31f   :  { %2067 = vpow2.f32 %v341_v1 }
 0x321   :  { %v540_v2 = vpop.xlane.xlu1 %539 }
 0x322   :  { %v542_v3 = vsub.f32 %v532_v53, %v540_v2  ;;  %v537_v4 = vpop.xlane.xlu0 %536 }
 0x323   :  { %v541_v6 = vsub.f32 %v527_v55, %v537_v4 }
 0x324   :  { %v545_v8 = vmul.f32 1.442695, %v542_v3 }
 0x325   :  { %v543_v9 = vmul.f32 1.442695, %v541_v6 }
 0x326   :  { %2069 = vpow2.f32 %v545_v8 }
 0x327   :  { %2071 = vpow2.f32 %v543_v9 }
 0x328   :  { %v2066_v10 = vpop.eup %2065 }
 0x329   :  { %v2068_v11 = vpop.eup %2067  ;;  %v348_v12 = vsel %vm332_vm3, %v2066_v10, 0.0 }
 0x32a   :  { %349 = vadd.xlane.f32.xlu1 %v348_v12  ;;  %v345_v13 = vsel %vm332_vm3, %v2068_v11, 0.0 }
 0x32b   :  { %346 = vadd.xlane.f32.xlu0 %v345_v13 }
 0x330   :  { %v2481_v14 = vpop.eup %2069 }
 0x331   :  { %v2072_v16 = vpop.eup %2071  ;;  %v550_v17 = vsel %vm332_vm3, %v2481_v14, 0.0 }
 0x332   :  { %551 = vadd.xlane.f32.xlu1 %v550_v17  ;;  %v547_v18 = vsel %vm332_vm3, %v2072_v16, 0.0 }
 0x333   :  { %548 = vadd.xlane.f32.xlu0 %v547_v18 }
 0x343   :  { %2046 = vrot.lane.b32.xlu1 %v2459_v43, %s2234_s3  ;;  %s2240_s3 = smov [#allocation10]  }
 0x347   :  { %2051 = vrot.lane.b32.xlu1 %v2428_v21, %s2235_s21  ;;  %s1672_s21 = sshll.u32 %s2240_s3, 4  ;;  %s1673_s21 = int_to_ptr.vmem [resolvable:$true] %s1672_s21 }
 0x348   :  { %p2198_p5 = scmp.lt.s32.totalorder %s1673_s21, %s1673_s21 }
 0x349   :  { %2041 = vrot.lane.b32.xlu0 %v2459_v43, %s2236_s23  ;;  %s2193_s23 = scalar_lea.vmem %s1673_s21, 256 }
 0x34a   :  { %p2194_p4 = scmp.ne.s32.totalorder %s1673_s21, %s2193_s23  ;;  %p2199_p6 = scmp.lt.s32.totalorder %s2193_s23, %s2193_s23 }
 0x34b   :  { %1091 = vrot.lane.b32.xlu1 %v2425_v19, %s2237_s25 }
 0x34c   :  { %p2200_p7 = por %p2199_p6, %p2198_p5 }
 0x34d   :  { %1089 = vrot.lane.b32.xlu0 %v2420_v15, %s2237_s25 }
 0x34e   :  { %p2201_p8 = pnand %p2200_p7, %p2194_p4 }
 0x36c   :  { %898 = vmax.xlane.f32.xlu0 %v897_v23 }
 0x36f   :  { %901 = vmax.xlane.f32.xlu1 %v900_v24 }
 0x380   :  { %2056 = vrot.lane.b32.xlu1 %v2459_v43, %s2238_s26 }
 0x384   :  { %2061 = vrot.lane.b32.xlu1 %v2459_v43, %s2239_s27 }
 0x3b7   :  { %v350_v19 = vpop.xlane.xlu1 %349 }
 0x3b8   :  { %v347_v21 = vpop.xlane.xlu0 %346 }
 0x3b9   :  { %2073 = vrcp.f32 %v347_v21 }
 0x3ba   :  { %2075 = vrcp.f32 %v350_v19 }
 0x3bf   :  { %v552_v15 = vpop.xlane.xlu1 %551 }
 0x3c0   :  { %v549_v25 = vpop.xlane.xlu0 %548 }
 0x3c1   :  { %2077 = vrcp.f32 %v549_v25 }
 0x3c2   :  { %2079 = vrcp.f32 %v552_v15 }
 0x3c3   :  { %v2074_v26 = vpop.eup %2073  ;;  %v2047_v28 = vpop.permute.xlu1 %2046 }
 0x3c4   :  { %v2042_v29 = vpop.permute.xlu0 %2041  ;;  %v353_v30 = vmul.f32 %v2074_v26, %v2068_v11  ;;  %v2049_v31 = vunpack.i.h.bf16 %v2047_v28  ;;  %v2048_v32 = vunpack.i.l.bf16 %v2047_v28  ;;  %v2076_v37 = vpop.eup %2075 }
 0x3c5   :  { %v2044_v33 = vunpack.i.h.bf16 %v2042_v29  ;;  %v2043_v34 = vunpack.i.l.bf16 %v2042_v29  ;;  %v354_v46 = vmul.f32 %v2076_v37, %v2066_v10 }
 0x3c6   :  { %1834 = vmatprep.mubr.msk.f32.mxu1 %vm332_vm3, %v353_v30  ;;  %v1953_v41 = vpack.c.bf16 %v2049_v31, %v2048_v32 }
 0x3c7   :  { %v2052_v35 = vpop.permute.xlu1 %2051  ;;  %v1943_v36 = vpack.c.bf16 %v2044_v33, %v2043_v34 }
 0x3c8   :  { %v2054_v38 = vunpack.i.h.bf16 %v2052_v35  ;;  %v2053_v39 = vunpack.i.l.bf16 %v2052_v35  ;;  %v1090_v40 = vpop.permute.xlu0 %1089 }
 0x3c9   :  { %1944 = vmatprep.subr.bf16.mxu1 %v1943_v36  ;;  %1884 = vmatprep.mubr.msk.f32.mxu0 %vm246_vm1, %v1090_v40 }
 0x3ca   :  { %v1967_v42 = vpack.c.bf16 %v2054_v38, %v2053_v39  ;;  %1946 = vmatpush3.bf16.msra.mxu1 %v1943_v36 }
 0x3cb   :  { %v2078_v43 = vpop.eup %2077  ;;  %1954 = vmatprep.subr.bf16.mxu1 %v1953_v41  ;;  %v1092_v50 = vpop.permute.xlu1 %1091 }
 0x3cc   :  { %v2080_v47 = vpop.eup %2079  ;;  %1969 = vmatprep.subr.msk.bf16.mxu0 %vm2437_vm2, %v1967_v42  ;;  %v555_v48 = vmul.f32 %v2078_v43, %v2072_v16 }
 0x3cd   :  { %1835 = vmatmul.mubr.msk.f32.vlgmr.msra.gmra.mrb[0].mxu1 %vm332_vm3, %v354_v46  ;;  %1972 = vmatpush3.bf16.xpose.msk.msra.mxu0 %vm2437_vm2, %v1967_v42  ;;  %v556_v49 = vmul.f32 %v2080_v47, %v2481_v14  ;;  %v239_v42 = vld [vmem:[%s2626_s6 + $0x18] sm:$0xff] }
 0x3ce   :  { %1956 = vmatpush3.bf16.msra.mxu1 %v1953_v41  ;;  %1848 = vmatprep.mubr.msk.f32.mxu1 %vm332_vm3, %v555_v48  ;;  %v1725_v48 = vld [vmem:[%s2627_s7] ss:$0 sm:$0xff] }
 0x3cf   :  { %1851 = vmatprep.subr.mxu1 %v237_v60 }
 0x3d1   :  { %1849 = vmatmul.mubr.msk.f32.vlgmr.msra.gmra.mrb[2].mxu1 %vm332_vm3, %v556_v49 }
 0x3d2   :  { %1852 = vmatpush3.msra.mxu1 %v237_v60 }
 0x3d3   :  { %1856 = vmatprep.subr.mxu1 %v236_v61 }
 0x3d4   :  { %1885 = vmatmul.mubr.msk.f32.vlgmr.msra.gmra.mrb[12].mxu0 %vm246_vm1, %v1092_v50 }
 0x3f9   :  { %v899_v51 = vpop.xlane.xlu0 %898 }
 0x3fa   :  { %v903_v52 = vsub.f32 %v889_v20, %v899_v51  ;;  %v238_v20 = vld [vmem:[%s2626_s6 + $0x10] sm:$0xff] }
 0x3fc   :  { %v905_v53 = vmul.f32 1.442695, %v903_v52  ;;  %v902_v54 = vpop.xlane.xlu1 %901 }
 0x3fd   :  { %v904_v55 = vsub.f32 %v894_v22, %v902_v54 }
 0x3fe   :  { %2081 = vpow2.f32 %v905_v53 }
 0x3ff   :  { %v907_v56 = vmul.f32 1.442695, %v904_v55 }
 0x400   :  { %v2057_v63 = vpop.permute.xlu1 %2056 }
 0x401   :  { %2083 = vpow2.f32 %v907_v56  ;;  %v2059_v3 = vunpack.i.h.bf16 %v2057_v63  ;;  %v2058_v4 = vunpack.i.l.bf16 %v2057_v63  ;;  %v1428_v63 = vld [vmem:[%s2630_s10] sm:$0xff] }
 0x403   :  { %v1963_v9 = vpack.c.bf16 %v2059_v3, %v2058_v4  ;;  %v1431_v3 = vld [vmem:[%s2630_s10 + $0x18] sm:$0xff] }
 0x404   :  { %v2062_v17 = vpop.permute.xlu1 %2061 }
 0x405   :  { %v2064_v22 = vunpack.i.h.bf16 %v2062_v17  ;;  %v2063_v23 = vunpack.i.l.bf16 %v2062_v17 }
 0x408   :  { %v2082_v27 = vpop.eup %2081 }
 0x409   :  { %v909_v57 = vsel %vm332_vm3, %v2082_v27, 0.0 }
 0x40a   :  { %910 = vadd.xlane.f32.xlu0 %v909_v57 }
 0x40b   :  { %v2084_v58 = vpop.eup %2083 }
 0x40c   :  { %v912_v59 = vsel %vm332_vm3, %v2084_v58, 0.0 }
 0x40e   :  { %913 = vadd.xlane.f32.xlu0 %v912_v59 }
 0x497   :  { %v911_v62 = vpop.xlane.xlu0 %910 }
 0x498   :  { %2085 = vrcp.f32 %v911_v62 }
 0x49b   :  { %v914_v1 = vpop.xlane.xlu0 %913 }
 0x49c   :  { %2087 = vrcp.f32 %v914_v1 }
 0x4a0   :  { %v1836_v0 = vpop.f32.mrb[0].mxu1 }
 0x4a1   :  { %v435_v2 = vpop.f32.mrb[1].mxu1 }
 0x4a2   :  { %v2086_v16 = vpop.eup %2085 }
 0x4a3   :  { %v917_v21 = vmul.f32 %v2086_v16, %v2082_v27 }
 0x4a4   :  { %v1850_v6 = vpop.f32.mrb[2].mxu1 }
 0x4a5   :  { %v635_v8 = vpop.f32.mrb[3].mxu1 }
 0x4a6   :  { %1853 = vmatprep.mubr.msk.f32.mxu1 %vm246_vm1, %v635_v8  ;;  %v2088_v18 = vpop.eup %2087  ;;  %v1523_v8 = vld [vmem:[%s2632_s12 + $0x8] sm:$0xff] }
 0x4a7   :  { %1854 = vmatmul.mubr.msk.f32.vlgmr.msra.gmra.mrb[4].mxu1 %vm246_vm1, %v1850_v6  ;;  %v1886_v10 = vpop.f32.mrb[12].mxu0  ;;  %v1522_v6 = vld [vmem:[%s2632_s12] sm:$0xff] }
 0x4a8   :  { %1857 = vmatpush3.msra.mxu1 %v236_v61  ;;  %1858 = vmatprep.mubr.msk.f32.mxu1 %vm246_vm1, %v435_v2  ;;  %v1171_v11 = vpop.f32.mrb[13].mxu0  ;;  %v1177_v13 = vadd.f32 %v1886_v10, %v2464_v44  ;;  %v918_v44 = vmul.f32 %v2088_v18, %v2084_v58  ;;  %v1430_v2 = vld [vmem:[%s2630_s10 + $0x10] sm:$0xff]  ;;  %v1985_v10 = vpack.c.bf16 %v1523_v8, %v1522_v6 }
 0x4a9   :  { %1964 = vmatprep.subr.bf16.mxu1 %v1963_v9  ;;  %v1172_v12 = vadd.f32 %v1171_v11, %v2469_v45  ;;  %v1973_v45 = vpack.c.bf16 %v2064_v22, %v2063_v23  ;;  %v1981_v4 = vpack.c.bf16 %v1431_v3, %v1430_v2  ;;  %v1525_v11 = vld [vmem:[%s2632_s12 + $0x18] sm:$0xff]  ;;  %v1734_v2 = vld [vmem:[%s2634_s14] ss:$0 sm:$0xff] }
 0x4aa   :  { %v1183_v24 = vsel %vm332_vm3, %v1177_v13, -inf }
 0x4ab   :  { %v1180_v14 = vsel %vm332_vm3, %v1172_v12, -inf }
 0x4ac   :  { %1181 = vmax.xlane.f32.xlu0 %v1180_v14  ;;  %v1527_v14 = vld [vmem:[%s2632_s12 + $0x28] sm:$0xff] }
 0x4af   :  { %1859 = vmatmul.mubr.msk.f32.vlgmr.msra.gmra.mrb[4].mxu1 %vm246_vm1, %v1836_v0  ;;  %v1429_v0 = vld [vmem:[%s2630_s10 + $0x8] sm:$0xff] }
 0x4b0   :  { %1966 = vmatpush3.bf16.msra.mxu1 %v1963_v9  ;;  %1184 = vmax.xlane.f32.xlu0 %v1183_v24  ;;  %v1977_v1 = vpack.c.bf16 %v1429_v0, %v1428_v63  ;;  %v1524_v9 = vld [vmem:[%s2632_s12 + $0x10] sm:$0xff] }
 0x4b1   :  { %1872 = vmatprep.mubr.msk.f32.mxu1 %vm332_vm3, %v917_v21  ;;  %1875 = vmatprep.subr.mxu1 %v238_v20 }
 0x4b2   :  { %1978 = vmatprep.subr.bf16.mxu0 %v1977_v1 }
 0x4b3   :  { %1873 = vmatmul.mubr.msk.f32.vlgmr.msra.gmra.mrb[6].mxu1 %vm332_vm3, %v918_v44  ;;  %1980 = vmatpush3.bf16.msra.mxu0 %v1977_v1  ;;  %v1726_v44 = vld [vmem:[%s2628_s8] ss:$0 sm:$0xff] }
 0x4b4   :  { %1876 = vmatpush3.msra.mxu1 %v238_v20  ;;  %1982 = vmatprep.subr.bf16.mxu0 %v1981_v4 }
 0x4b5   :  { %1974 = vmatprep.subr.bf16.mxu1 %v1973_v45 }
 0x4b7   :  { %1984 = vmatpush3.bf16.msra.mxu0 %v1981_v4  ;;  %v1735_v4 = vld [vmem:[%s2635_s15] ss:$0 sm:$0xff] }
 0x539   :  { %v1182_v19 = vpop.xlane.xlu0 %1181 }
 0x53a   :  { %v1186_v15 = vsub.f32 %v1172_v12, %v1182_v19  ;;  %v1989_v12 = vpack.c.bf16 %v1525_v11, %v1524_v9  ;;  %v1727_v19 = vld [vmem:[%s2629_s9] ss:$0 sm:$0xff] }
 0x53c   :  { %v1188_v25 = vmul.f32 1.442695, %v1186_v15 }
 0x53d   :  { %v1185_v26 = vpop.xlane.xlu0 %1184 }
 0x53e   :  { %2089 = vpow2.f32 %v1188_v25  ;;  %v1187_v28 = vsub.f32 %v1177_v13, %v1185_v26  ;;  %v1526_v13 = vld [vmem:[%s2632_s12 + $0x20] sm:$0xff] }
 0x53f   :  { %v1993_v16 = vpack.c.bf16 %v1527_v14, %v1526_v13 }
 0x540   :  { %v1190_v29 = vmul.f32 1.442695, %v1187_v28 }
 0x542   :  { %2091 = vpow2.f32 %v1190_v29 }
 0x548   :  { %v2090_v30 = vpop.eup %2089 }
 0x549   :  { %v1192_v31 = vsel %vm332_vm3, %v2090_v30, 0.0 }
 0x54a   :  { %1193 = vadd.xlane.f32.xlu0 %v1192_v31  ;;  %v1528_v31 = vld [vmem:[%s2632_s12 + $0x30] sm:$0xff] }
 0x54c   :  { %v2092_v32 = vpop.eup %2091 }
 0x54d   :  { %v1195_v33 = vsel %vm332_vm3, %v2092_v32, 0.0 }
 0x54e   :  { %1196 = vadd.xlane.f32.xlu0 %v1195_v33 }
 0x586   :  { %v1874_v34 = vpop.f32.mrb[6].mxu1 }
 0x587   :  { %v997_v35 = vpop.f32.mrb[7].mxu1 }
 0x588   :  { %1877 = vmatprep.mubr.msk.f32.mxu1 %vm246_vm1, %v997_v35 }
 0x589   :  { %1878 = vmatmul.mubr.msk.f32.vlgmr.msra.gmra.mrb[4].mxu1 %vm246_vm1, %v1874_v34  ;;  %v1728_v34 = vld [vmem:[#allocation7] ss:$0 sm:$0xff] }
 0x58a   :  { %1976 = vmatpush3.bf16.msra.mxu1 %v1973_v45 }
 0x58b   :  { %1894 = vmatprep.subr.mxu1 %v239_v42 }
 0x5d7   :  { %v1194_v36 = vpop.xlane.xlu0 %1193 }
 0x5d8   :  { %2093 = vrcp.f32 %v1194_v36 }
 0x5db   :  { %v1197_v37 = vpop.xlane.xlu0 %1196 }
 0x5dc   :  { %2095 = vrcp.f32 %v1197_v37 }
 0x5e2   :  { %v2094_v38 = vpop.eup %2093 }
 0x5e3   :  { %v1200_v39 = vmul.f32 %v2094_v38, %v2090_v30 }
 0x5e5   :  { %1891 = vmatprep.mubr.msk.f32.mxu1 %vm332_vm3, %v1200_v39 }
 0x5e6   :  { %v2096_v40 = vpop.eup %2095 }
 0x5e7   :  { %v1201_v41 = vmul.f32 %v2096_v40, %v2092_v32  ;;  %v1529_v32 = vld [vmem:[%s2632_s12 + $0x38] sm:$0xff] }
 0x5e8   :  { %v1997_v33 = vpack.c.bf16 %v1529_v32, %v1528_v31 }
 0x5e9   :  { %1892 = vmatmul.mubr.msk.f32.vlgmr.msra.gmra.mrb[8].mxu1 %vm332_vm3, %v1201_v41  ;;  %v1731_v41 = vld [vmem:[#allocation8] ss:$0 sm:$0xff] }
 0x5ea   :  { %1895 = vmatpush3.msra.mxu1 %v239_v42 }
 0x5eb   :  { %1986 = vmatprep.subr.bf16.mxu1 %v1985_v10 }
 0x6bc   :  { %v1893_v43 = vpop.f32.mrb[8].mxu1 }
 0x6bd   :  { %v1280_v46 = vpop.f32.mrb[9].mxu1 }
 0x6be   :  { %1896 = vmatprep.mubr.msk.f32.mxu1 %vm246_vm1, %v1280_v46 }
 0x6bf   :  { %1897 = vmatmul.mubr.msk.f32.vlgmr.msra.gmra.mrb[4].mxu1 %vm246_vm1, %v1893_v43 }
 0x6c0   :  { %1988 = vmatpush3.bf16.msra.mxu1 %v1985_v10 }
 0x6c1   :  { %1990 = vmatprep.subr.bf16.mxu1 %v1989_v12 }
 0x6c4   :  { %1992 = vmatpush3.bf16.msra.mxu1 %v1989_v12 }
 0x6c5   :  { %1994 = vmatprep.subr.bf16.mxu1 %v1993_v16 }
 0x6c8   :  { %1996 = vmatpush3.bf16.msra.mxu1 %v1993_v16 }
 0x6c9   :  { %1998 = vmatprep.subr.bf16.mxu1 %v1997_v33 }
 0x6cc   :  { %2000 = vmatpush3.bf16.msra.mxu1 %v1997_v33 }
 0x792   :  { %v1898_v47 = vpop.f32.mrb[4].mxu1 }
 0x793   :  { %v1373_v49 = vadd.f32 %v1898_v47, %v2406_v7  ;;  %v1361_v50 = vpop.f32.mrb[5].mxu1 }
 0x794   :  { %v1372_v51 = vadd.f32 %v1361_v50, %v2399_v5 }
 0x795   :  { %v1382_v52 = vadd.f32 %v1725_v48, %v1373_v49 }
 0x796   :  { %v1381_v53 = vadd.f32 %v1725_v48, %v1372_v51 }
 0x797   :  { %v1388_v54 = vsel %vm122_vm0, %v1382_v52, 0.0 }
 0x798   :  { %1389 = vadd.xlane.f32.xlu1 %v1388_v54  ;;  %v1385_v55 = vsel %vm122_vm0, %v1381_v53, 0.0 }
 0x799   :  { %1386 = vadd.xlane.f32.xlu0 %v1385_v55 }
 0x825   :  { %v1390_v56 = vpop.xlane.xlu1 %1389 }
 0x826   :  { %v1393_v27 = vmul.f32 0.03125, %v1390_v56  ;;  %v1387_v57 = vpop.xlane.xlu0 %1386 }
 0x827   :  { %v1392_v58 = vmul.f32 0.03125, %v1387_v57 }
 0x828   :  { %v1395_v59 = vsub.f32 %v1382_v52, %v1393_v27 }
 0x829   :  { %v1394_v60 = vsub.f32 %v1381_v53, %v1392_v58 }
 0x82a   :  { %v1397_v62 = vmul.f32 %v1395_v59, %v1395_v59 }
 0x82b   :  { %v1396_v61 = vmul.f32 %v1394_v60, %v1394_v60 }
 0x82c   :  { %v1401_v5 = vsel %vm122_vm0, %v1397_v62, 0.0 }
 0x82d   :  { %v1398_v7 = vsel %vm122_vm0, %v1396_v61, 0.0 }
 0x82e   :  { %1399 = vadd.xlane.f32.xlu0 %v1398_v7 }
 0x832   :  { %1402 = vadd.xlane.f32.xlu0 %v1401_v5 }
 0x8bb   :  { %v1400_v17 = vpop.xlane.xlu0 %1399 }
 0x8bc   :  { %v1404_v18 = vmul.f32 0.03125, %v1400_v17 }
 0x8be   :  { %v1406_v20 = vadd.f32 1e-05, %v1404_v18 }
 0x8bf   :  { %v1403_v22 = vpop.xlane.xlu0 %1402 }
 0x8c0   :  { %2097 = vrsqrt.f32 %v1406_v20  ;;  %v1405_v23 = vmul.f32 0.03125, %v1403_v22 }
 0x8c2   :  { %v1407_v24 = vadd.f32 1e-05, %v1405_v23 }
 0x8c4   :  { %2099 = vrsqrt.f32 %v1407_v24 }
 0x8ca   :  { %v2098_v21 = vpop.eup %2097 }
 0x8cb   :  { %v1410_v45 = vmul.f32 %v2098_v21, %v1394_v60 }
 0x8cd   :  { %v1418_v15 = vmul.f32 %v1726_v44, %v1410_v45 }
 0x8ce   :  { %v2100_v25 = vpop.eup %2099 }
 0x8cf   :  { %v1411_v26 = vmul.f32 %v2100_v25, %v1395_v59  ;;  %v1426_v28 = vadd.f32 %v1727_v19, %v1418_v15 }
 0x8d1   :  { %v1419_v29 = vmul.f32 %v1726_v44, %v1411_v26  ;;  %1907 = vmatprep.mubr.msk.f32.mxu0 %vm122_vm0, %v1426_v28 }
 0x8d3   :  { %v1427_v30 = vadd.f32 %v1727_v19, %v1419_v29 }
 0x8d5   :  { %1908 = vmatmul.mubr.msk.f32.vlgmr.msra.gmra.mrb[14].mxu0 %vm122_vm0, %v1427_v30 }
 0x9a8   :  { %v1909_v35 = vpop.f32.mrb[14].mxu0 }
 0x9a9   :  { %v1517_v36 = vadd.f32 %v1909_v35, %v1728_v34  ;;  %v1511_v37 = vpop.f32.mrb[15].mxu0 }
 0x9aa   :  { %v1512_v38 = vadd.f32 %v1728_v34, %v1511_v37 }
 0x9ab   :  { %v1521_v40 = vmax.f32 %v1517_v36, 0.0 }
 0x9ac   :  { %v1520_v39 = vmax.f32 %v1512_v38, 0.0 }
 0x9ae   :  { %1926 = vmatprep.mubr.msk.f32.mxu1 %vm1537_vm4, %v1520_v39 }
 0x9af   :  { %1927 = vmatmul.mubr.msk.f32.vlgmr.msra.gmra.mrb[10].mxu1 %vm1537_vm4, %v1521_v40 }
 0xa82   :  { %v1928_v42 = vpop.f32.mrb[10].mxu1 }
 0xa83   :  { %v1610_v43 = vpop.f32.mrb[11].mxu1  ;;  %v1616_v46 = vadd.f32 %v1928_v42, %v1731_v41 }
 0xa84   :  { %v1611_v47 = vadd.f32 %v1731_v41, %v1610_v43 }
 0xa85   :  { %v1620_v50 = vadd.f32 %v1616_v46, %v1427_v30 }
 0xa86   :  { %v1619_v48 = vadd.f32 %v1611_v47, %v1426_v28 }
 0xa87   :  { %v1626_v51 = vsel %vm122_vm0, %v1620_v50, 0.0 }
 0xa88   :  { %v1623_v49 = vsel %vm122_vm0, %v1619_v48, 0.0 }
 0xa89   :  { %1624 = vadd.xlane.f32.xlu0 %v1623_v49 }
 0xa8d   :  { %1627 = vadd.xlane.f32.xlu0 %v1626_v51 }
 0xb16   :  { %v1625_v52 = vpop.xlane.xlu0 %1624 }
 0xb17   :  { %v1629_v53 = vmul.f32 0.03125, %v1625_v52 }
 0xb19   :  { %v1631_v54 = vsub.f32 %v1619_v48, %v1629_v53 }
 0xb1a   :  { %v1628_v55 = vpop.xlane.xlu0 %1627 }
 0xb1b   :  { %v1630_v56 = vmul.f32 0.03125, %v1628_v55  ;;  %v1633_v27 = vmul.f32 %v1631_v54, %v1631_v54 }
 0xb1d   :  { %v1632_v57 = vsub.f32 %v1620_v50, %v1630_v56  ;;  %v1635_v58 = vsel %vm122_vm0, %v1633_v27, 0.0 }
 0xb1e   :  { %1636 = vadd.xlane.f32.xlu0 %v1635_v58 }
 0xb1f   :  { %v1634_v59 = vmul.f32 %v1632_v57, %v1632_v57 }
 0xb21   :  { %v1638_v60 = vsel %vm122_vm0, %v1634_v59, 0.0 }
 0xb22   :  { %1639 = vadd.xlane.f32.xlu0 %v1638_v60 }
 0xbab   :  { %v1637_v61 = vpop.xlane.xlu0 %1636 }
 0xbac   :  { %v1641_v7 = vmul.f32 0.03125, %v1637_v61 }
 0xbae   :  { %v1643_v62 = vadd.f32 1e-05, %v1641_v7 }
 0xbaf   :  { %v1640_v5 = vpop.xlane.xlu0 %1639 }
 0xbb0   :  { %2101 = vrsqrt.f32 %v1643_v62  ;;  %v1642_v63 = vmul.f32 0.03125, %v1640_v5 }
 0xbb2   :  { %v1644_v0 = vadd.f32 1e-05, %v1642_v63 }
 0xbb4   :  { %2103 = vrsqrt.f32 %v1644_v0 }
 0xbba   :  { %v2102_v1 = vpop.eup %2101 }
 0xbbb   :  { %v1647_v3 = vmul.f32 %v2102_v1, %v1631_v54 }
 0xbbd   :  { %v1655_v6 = vmul.f32 %v1734_v2, %v1647_v3 }
 0xbbe   :  { %v2104_v8 = vpop.eup %2103 }
 0xbbf   :  { %v1648_v9 = vmul.f32 %v2104_v8, %v1632_v57  ;;  %v1663_v10 = vadd.f32 %v1735_v4, %v1655_v6 }
 0xbc1   :  { %v1656_v11 = vmul.f32 %v1734_v2, %v1648_v9  ;;  %1665 = vst.msk [vmem:[#allocation10] sm:$0xff] %vm122_vm0, %v1663_v10 }
 0xbc3   :  { %v1664_v12 = vadd.f32 %v1735_v4, %v1656_v11 }
 0xbc5   :  { %1666 = vst.msk [vmem:[#allocation10 + $0x8] sm:$0xff] %vm122_vm0, %v1664_v12 }
 0xbc6   :  { %2204 = shalt.err (!%p2201_p8)
}
 0xbc7   :  { %s2205_s25 = scalar_lea.hbm %s2636_s16, 256 }
 0xbc8   :  { %p2206_p9 = scmp.ne.s32.totalorder %s2636_s16, %s2205_s25  ;;  %p2209_p10 = scmp.lt.u32.totalorder %s2205_s25, %s2636_s16 }
 0xbca   :  { %p2211_p11 = pnand %p2209_p10, %p2206_p9 }
 0xbcc   :  { %2214 = shalt.err (!%p2211_p11)
}
 0xbcd   :  { %1678 = dma.vmem_to_hbm [thread:$0]  %s1673_s21, 256, %s2636_s16, [#allocation4], %s2225_s5, %s2225_s5, %s2226_s22  }
 0xbce   :  { %2221 = dma.done.wait [#allocation4], 256  }
 0xbcf   :  { %2222 = vsyncadd [#allocation4], 4294967040 }
 0xbd0   :  { %1682 = vsyncpa [#allocation3], 1 }
 0xbd1   :  { %1683 = vsyncpa [#allocation6], 1 }
 0xbd2   :  { %1684 = vsyncpa [#allocation9], 1 }
 0xbd3   :  { %1685 = vsyncpa [#allocation4], 1 }

</bundles_post_ra>
